<compile_context>
chip_gen: v5e
topology: v5e:2x2
jax: 0.10.0
libtpu: 0.0.40
codegen_flags: <defaults>
</compile_context>

<pallas_src>
import functools

import jax
import jax.numpy as jnp
from jax.experimental import pallas as pl
from jax.experimental.pallas import tpu as pltpu


_LANES = 128
_DEFAULT_TILE_ROWS = 2048                 # 2048 x 128 x 4 B = 1 MiB per f32 block
_VMEM_LIMIT_BYTES = 32 * 1024 * 1024      # safe on v5e / v6e / v7x


def _round_up(x, m):
    return (x + m - 1) // m * m


def _choose_tile_rows(rows, tile_rows):
    """Sublane tile size. Either full-extent (rounded to 8) or a multiple of 32
    so both f32 and int8 output blocks are tile-aligned."""
    if rows <= tile_rows:
        return _round_up(rows, 8)
    return _round_up(tile_rows, 32)


def _pad_features(x, f_pad):
    """Zero-pad the last (feature) axis of x up to f_pad (no-op if aligned)."""
    f = x.shape[-1]
    if f == f_pad:
        return x
    pad = [(0, 0)] * (x.ndim - 1) + [(0, f_pad - f)]
    return jnp.pad(x, pad)


# ---------------------------------------------------------------------------
# Single-timestep kernel (mirrors one ERLIF.forward call)
# ---------------------------------------------------------------------------

def _erlif_step_kernel(beta_ref, x_ref, g_ref, m_ref, spike_ref, mem_ref,
                       *, threshold, reset_mechanism):
    """One (TM, 128) feature tile of one batch element.

    beta_ref : SMEM (B,)       per-batch time constant
    x_ref    : VMEM (TM, 128)  input current tile
    g_ref    : VMEM (TM, 128)  membrane resistance (gamma) tile
    m_ref    : VMEM (TM, 128)  previous membrane potential tile
    spike_ref: VMEM (TM, 128)  spike output (int8 by default)
    mem_ref  : VMEM (TM, 128)  post-reset membrane potential
    """
    b = pl.program_id(0)
    beta = beta_ref[b]                                    # scalar from SMEM

    mem_new = beta * m_ref[...] + g_ref[...] * x_ref[...]
    spike = (mem_new - threshold) > 0.0                   # heaviside fwd

    if reset_mechanism == "subtract":
        mem_post = mem_new - spike.astype(mem_new.dtype) * threshold
    elif reset_mechanism == "zero":
        mem_post = jnp.where(spike, jnp.zeros_like(mem_new), mem_new)
    else:  # no reset
        mem_post = mem_new

    spike_ref[...] = spike.astype(spike_ref.dtype)
    mem_ref[...] = mem_post


def erlif_forward(input_current, beta, gamma, mem_prev=None, *,
                  threshold=1.0, reset_mechanism="subtract",
                  spike_dtype=jnp.int8, tile_rows=_DEFAULT_TILE_ROWS):
    """Functional single-step ERLIF forward.

    input_current: (B, C, H, W)
    beta         : (B, 1) or (B,)  per-batch time constant
    gamma        : (B, C, H, W)
    mem_prev     : (B, C, H, W) or None (initial membrane potential = 0)
    Returns (spike[(B,C,H,W), spike_dtype], membrane_potential[(B,C,H,W)]).
    """
    B, C, H, W = input_current.shape
    F = C * H * W
    dtype = input_current.dtype

    if mem_prev is None:
        mem_prev = jnp.zeros_like(input_current)

    rows = pl.cdiv(F, _LANES)
    tm = _choose_tile_rows(rows, tile_rows)
    n_blocks = pl.cdiv(rows, tm)
    rows_pad = n_blocks * tm
    f_pad = rows_pad * _LANES

    x_p = _pad_features(input_current.reshape(B, F), f_pad).reshape(B, rows_pad, _LANES)
    g_p = _pad_features(gamma.astype(dtype).reshape(B, F), f_pad).reshape(B, rows_pad, _LANES)
    m_p = _pad_features(mem_prev.astype(dtype).reshape(B, F), f_pad).reshape(B, rows_pad, _LANES)
    beta_v = jnp.broadcast_to(jnp.asarray(beta, dtype).reshape(-1), (B,))

    feat_spec = pl.BlockSpec((None, tm, _LANES), lambda b, j: (b, j, 0))
    beta_spec = pl.BlockSpec(memory_space=pltpu.MemorySpace.SMEM)

    kernel = functools.partial(_erlif_step_kernel,
                               threshold=float(threshold),
                               reset_mechanism=reset_mechanism)

    spike_p, mem_out_p = pl.pallas_call(
        kernel,
        out_shape=(jax.ShapeDtypeStruct((B, rows_pad, _LANES), spike_dtype),
                   jax.ShapeDtypeStruct((B, rows_pad, _LANES), dtype)),
        grid_spec=pltpu.PrefetchScalarGridSpec(
            num_scalar_prefetch=0,
            grid=(B, n_blocks),
            in_specs=[beta_spec, feat_spec, feat_spec, feat_spec],
            out_specs=[feat_spec, feat_spec],
        ),
        # Inputs are (beta, x, gamma, mem_prev): donate mem_prev to the membrane output.
        input_output_aliases={3: 1},
        compiler_params=pltpu.CompilerParams(
            dimension_semantics=("parallel", "parallel"),
            vmem_limit_bytes=_VMEM_LIMIT_BYTES),
    )(beta_v, x_p, g_p, m_p)

    spike = spike_p.reshape(B, f_pad)[:, :F].reshape(B, C, H, W)
    mem_out = mem_out_p.reshape(B, f_pad)[:, :F].reshape(B, C, H, W)
    return spike, mem_out


# ---------------------------------------------------------------------------
# Fused multi-timestep kernel: membrane potential stays resident in VMEM
# across the (innermost, "arbitrary") time axis.
# ---------------------------------------------------------------------------

def _erlif_seq_kernel(beta_ref, x_ref, g_ref, m0_ref, spike_ref, mem_ref, mem_acc,
                      *, threshold, reset_mechanism, batch):
    b = pl.program_id(0)
    t = pl.program_id(2)

    @pl.when(t == 0)
    def _():
        mem_acc[...] = m0_ref[...]

    beta = beta_ref[t * batch + b]                        # scalar from SMEM

    mem_new = beta * mem_acc[...] + g_ref[...] * x_ref[...]
    spike = (mem_new - threshold) > 0.0

    if reset_mechanism == "subtract":
        mem_post = mem_new - spike.astype(mem_new.dtype) * threshold
    elif reset_mechanism == "zero":
        mem_post = jnp.where(spike, jnp.zeros_like(mem_new), mem_new)
    else:
        mem_post = mem_new

    mem_acc[...] = mem_post
    spike_ref[...] = spike.astype(spike_ref.dtype)
    mem_ref[...] = mem_post


def erlif_forward_sequence(input_seq, beta_seq, gamma_seq, mem_init=None, *,
                           threshold=1.0, reset_mechanism="subtract",
                           spike_dtype=jnp.int8, tile_rows=_DEFAULT_TILE_ROWS):
    """Fused T-step ERLIF (equivalent to calling ERLIF per timestep after init_potential).

    input_seq: (T, B, C, H, W)   beta_seq: (T, B) or (T, B, 1)   gamma_seq: (T, B, C, H, W)
    Returns (spikes[(T,B,C,H,W), spike_dtype], membrane_potentials[(T,B,C,H,W)]).
    """
    T, B, C, H, W = input_seq.shape
    F = C * H * W
    dtype = input_seq.dtype

    if mem_init is None:
        mem_init = jnp.zeros((B, C, H, W), dtype)

    rows = pl.cdiv(F, _LANES)
    tm = _choose_tile_rows(rows, tile_rows)
    n_blocks = pl.cdiv(rows, tm)
    rows_pad = n_blocks * tm
    f_pad = rows_pad * _LANES

    x_p = _pad_features(input_seq.reshape(T, B, F), f_pad).reshape(T, B, rows_pad, _LANES)
    g_p = _pad_features(gamma_seq.astype(dtype).reshape(T, B, F), f_pad).reshape(T, B, rows_pad, _LANES)
    m0_p = _pad_features(mem_init.astype(dtype).reshape(B, F), f_pad).reshape(B, rows_pad, _LANES)
    beta_v = jnp.asarray(beta_seq, dtype).reshape(T * B)       # flat (T*B,) in SMEM

    seq_spec = pl.BlockSpec((None, None, tm, _LANES), lambda b, j, t: (t, b, j, 0))
    m0_spec = pl.BlockSpec((None, tm, _LANES), lambda b, j, t: (b, j, 0))
    beta_spec = pl.BlockSpec(memory_space=pltpu.MemorySpace.SMEM)

    kernel = functools.partial(_erlif_seq_kernel,
                               threshold=float(threshold),
                               reset_mechanism=reset_mechanism,
                               batch=B)

    spike_p, mem_p = pl.pallas_call(
        kernel,
        out_shape=(jax.ShapeDtypeStruct((T, B, rows_pad, _LANES), spike_dtype),
                   jax.ShapeDtypeStruct((T, B, rows_pad, _LANES), dtype)),
        grid_spec=pltpu.PrefetchScalarGridSpec(
            num_scalar_prefetch=0,
            grid=(B, n_blocks, T),                  # time innermost: mem stays in VMEM
            in_specs=[beta_spec, seq_spec, seq_spec, m0_spec],
            out_specs=[seq_spec, seq_spec],
            scratch_shapes=[pltpu.VMEM((tm, _LANES), dtype)],
        ),
        compiler_params=pltpu.CompilerParams(
            dimension_semantics=("parallel", "parallel", "arbitrary"),
            vmem_limit_bytes=_VMEM_LIMIT_BYTES),
    )(beta_v, x_p, g_p, m0_p)

    spike = spike_p.reshape(T, B, f_pad)[..., :F].reshape(T, B, C, H, W)
    mem = mem_p.reshape(T, B, f_pad)[..., :F].reshape(T, B, C, H, W)
    return spike, mem


# ---------------------------------------------------------------------------
# Thin stateful wrapper mirroring the PyTorch module's interface
# ---------------------------------------------------------------------------

class ERLIF:
    def __init__(self, threshold=1.0, reset_mechanism="subtract"):
        self.threshold = threshold
        self.reset_mechanism = reset_mechanism
        self.membrane_potential = None        # 0.0 until first forward

    def __call__(self, input_current, beta, gamma):
        spike_i8, mem = erlif_forward(
            input_current, beta, gamma, self.membrane_potential,
            threshold=self.threshold, reset_mechanism=self.reset_mechanism,
            spike_dtype=jnp.int8)
        self.membrane_potential = mem
        # Module returns a float spike; the cast fuses into downstream consumers.
        return spike_i8.astype(input_current.dtype), mem

    def init_potential(self):
        self.membrane_potential = None


# ---------------------------------------------------------------------------
# Pure-JAX reference & self-test
# ---------------------------------------------------------------------------

def _reference_step(x, beta, gamma, mem_prev, threshold, reset_mechanism):
    mem = beta.reshape(-1, 1, 1, 1) * mem_prev + gamma * x
    spike = ((mem - threshold) > 0).astype(x.dtype)
    if reset_mechanism == "subtract":
        mem = mem - spike * threshold
    elif reset_mechanism == "zero":
        mem = jnp.where(spike > 0, 0.0, mem)
    return spike, mem


if __name__ == "__main__":
    key = jax.random.PRNGKey(0)
    k1, k2, k3 = jax.random.split(key, 3)

    T, B, C, H, W = 8, 2, 4, 16, 16
    x_seq = jax.random.normal(k1, (T, B, C, H, W), dtype=jnp.float32) * 2.0
    beta_seq = jax.random.uniform(k2, (T, B, 1), dtype=jnp.float32,
                                  minval=0.5, maxval=0.99)
    gamma_seq = jax.random.uniform(k3, (T, B, C, H, W), dtype=jnp.float32,
                                   minval=0.5, maxval=1.5)
    threshold = 1.0

    for reset in ("subtract", "zero"):
        # --- Stateful per-timestep path (mirrors ERSNNv2's time loop) ---
        neuron = ERLIF(threshold=threshold, reset_mechanism=reset)
        mem_r = jnp.zeros((B, C, H, W), jnp.float32)
        for t in range(T):
            spike, mem = neuron(x_seq[t], beta_seq[t], gamma_seq[t])
            spike_r, mem_r = _reference_step(x_seq[t], beta_seq[t], gamma_seq[t],
                                             mem_r, threshold, reset)
            assert jnp.allclose(spike, spike_r), f"spike mismatch ({reset}, t={t})"
            assert jnp.allclose(mem, mem_r, atol=1e-5), f"membrane mismatch ({reset}, t={t})"

        # --- Fused T-step kernel (membrane kept in VMEM across timesteps) ---
        spike_f, mem_f = erlif_forward_sequence(
            x_seq, beta_seq, gamma_seq,
            threshold=threshold, reset_mechanism=reset)
        mem_r = jnp.zeros((B, C, H, W), jnp.float32)
        for t in range(T):
            spike_r, mem_r = _reference_step(x_seq[t], beta_seq[t], gamma_seq[t],
                                             mem_r, threshold, reset)
            assert jnp.allclose(spike_f[t].astype(jnp.float32), spike_r), \
                f"seq spike mismatch ({reset}, t={t})"
            assert jnp.allclose(mem_f[t], mem_r, atol=1e-5), \
                f"seq membrane mismatch ({reset}, t={t})"

    jax.block_until_ready((spike, mem, spike_f, mem_f))
    print("KERNEL_OK")
</pallas_src>

<mosaic_0001>
module attributes {stable_mosaic.version = 11 : i64} {
  func.func @_erlif_step_kernel(%arg0: i32, %arg1: i32, %arg2: memref<2xf32, #tpu.memory_space<smem>>, %arg3: memref<1x8x128xf32, #tpu.memory_space<vmem>>, %arg4: memref<1x8x128xf32, #tpu.memory_space<vmem>>, %arg5: memref<1x8x128xf32, #tpu.memory_space<vmem>>, %arg6: memref<1x8x128xi8, #tpu.memory_space<vmem>>, %arg7: memref<1x8x128xf32, #tpu.memory_space<vmem>>) attributes {dimension_semantics = [#tpu.dimension_semantics<parallel>, #tpu.dimension_semantics<parallel>], iteration_bounds = array<i64: 2, 1>, scalar_prefetch = 0 : i64, scratch_operands = 0 : i64, tpu.core_type = #tpu.core_type<tc>, window_params = [{transform_indices = @transform_0, window_bounds = array<i64: 2>}, {transform_indices = @transform_1, window_bounds = array<i64: 1, 8, 128>}, {transform_indices = @transform_2, window_bounds = array<i64: 1, 8, 128>}, {transform_indices = @transform_3, window_bounds = array<i64: 1, 8, 128>}, {transform_indices = @transform_4, window_bounds = array<i64: 1, 8, 128>}, {transform_indices = @transform_5, window_bounds = array<i64: 1, 8, 128>}]} {
    %0 = arith.index_cast %arg0 : i32 to index
    %1 = memref.load %arg2[%0] : memref<2xf32, #tpu.memory_space<smem>>
    %c0 = arith.constant 0 : index
    %c0_0 = arith.constant 0 : index
    %c0_1 = arith.constant 0 : index
    %2 = vector.load %arg5[%c0, %c0_0, %c0_1] : memref<1x8x128xf32, #tpu.memory_space<vmem>>, vector<1x8x128xf32>
    %3 = vector.shape_cast %2 : vector<1x8x128xf32> to vector<8x128xf32>
    %4 = vector.broadcast %1 : f32 to vector<8x128xf32>
    %5 = arith.mulf %4, %3 : vector<8x128xf32>
    %c0_2 = arith.constant 0 : index
    %c0_3 = arith.constant 0 : index
    %c0_4 = arith.constant 0 : index
    %6 = vector.load %arg4[%c0_2, %c0_3, %c0_4] : memref<1x8x128xf32, #tpu.memory_space<vmem>>, vector<1x8x128xf32>
    %7 = vector.shape_cast %6 : vector<1x8x128xf32> to vector<8x128xf32>
    %c0_5 = arith.constant 0 : index
    %c0_6 = arith.constant 0 : index
    %c0_7 = arith.constant 0 : index
    %8 = vector.load %arg3[%c0_5, %c0_6, %c0_7] : memref<1x8x128xf32, #tpu.memory_space<vmem>>, vector<1x8x128xf32>
    %9 = vector.shape_cast %8 : vector<1x8x128xf32> to vector<8x128xf32>
    %10 = arith.mulf %7, %9 : vector<8x128xf32>
    %11 = arith.addf %5, %10 : vector<8x128xf32>
    %cst = arith.constant 1.000000e+00 : f32
    %12 = vector.broadcast %cst : f32 to vector<8x128xf32>
    %13 = arith.subf %11, %12 : vector<8x128xf32>
    %cst_8 = arith.constant 0.000000e+00 : f32
    %14 = vector.broadcast %cst_8 : f32 to vector<8x128xf32>
    %15 = arith.cmpf ogt, %13, %14 : vector<8x128xf32>
    %16 = arith.extui %15 : vector<8x128xi1> to vector<8x128xi32>
    %17 = arith.sitofp %16 : vector<8x128xi32> to vector<8x128xf32>
    %cst_9 = arith.constant 1.000000e+00 : f32
    %18 = vector.broadcast %cst_9 : f32 to vector<8x128xf32>
    %19 = arith.mulf %17, %18 : vector<8x128xf32>
    %20 = arith.subf %11, %19 : vector<8x128xf32>
    %21 = arith.extui %15 : vector<8x128xi1> to vector<8x128xi8>
    %c0_10 = arith.constant 0 : index
    %c0_11 = arith.constant 0 : index
    %c0_12 = arith.constant 0 : index
    %22 = vector.load %arg6[%c0_10, %c0_11, %c0_12] : memref<1x8x128xi8, #tpu.memory_space<vmem>>, vector<1x8x128xi8>
    %23 = vector.shape_cast %22 : vector<1x8x128xi8> to vector<8x128xi8>
    %24 = vector.shape_cast %21 : vector<8x128xi8> to vector<1x8x128xi8>
    tpu.vector_store %arg6[%c0_10, %c0_11, %c0_12], %24 {strides = array<i32>} : memref<1x8x128xi8, #tpu.memory_space<vmem>>, vector<1x8x128xi8>,
    %c0_13 = arith.constant 0 : index
    %c0_14 = arith.constant 0 : index
    %c0_15 = arith.constant 0 : index
    %25 = vector.load %arg7[%c0_13, %c0_14, %c0_15] : memref<1x8x128xf32, #tpu.memory_space<vmem>>, vector<1x8x128xf32>
    %26 = vector.shape_cast %25 : vector<1x8x128xf32> to vector<8x128xf32>
    %27 = vector.shape_cast %20 : vector<8x128xf32> to vector<1x8x128xf32>
    tpu.vector_store %arg7[%c0_13, %c0_14, %c0_15], %27 {strides = array<i32>} : memref<1x8x128xf32, #tpu.memory_space<vmem>>, vector<1x8x128xf32>,
    return
  }
  func.func @transform_0(%arg0: i32, %arg1: i32) -> i32 {
    %c0_i32 = arith.constant 0 : i32
    %c0_i32_0 = arith.constant 0 : i32
    return %c0_i32 : i32
  }
  func.func @transform_1(%arg0: i32, %arg1: i32) -> (i32, i32, i32) {
    %c0_i32 = arith.constant 0 : i32
    %c0_i32_0 = arith.constant 0 : i32
    return %arg0, %arg1, %c0_i32 : i32, i32, i32
  }
  func.func @transform_2(%arg0: i32, %arg1: i32) -> (i32, i32, i32) {
    %c0_i32 = arith.constant 0 : i32
    %c0_i32_0 = arith.constant 0 : i32
    return %arg0, %arg1, %c0_i32 : i32, i32, i32
  }
  func.func @transform_3(%arg0: i32, %arg1: i32) -> (i32, i32, i32) {
    %c0_i32 = arith.constant 0 : i32
    %c0_i32_0 = arith.constant 0 : i32
    return %arg0, %arg1, %c0_i32 : i32, i32, i32
  }
  func.func @transform_4(%arg0: i32, %arg1: i32) -> (i32, i32, i32) {
    %c0_i32 = arith.constant 0 : i32
    %c0_i32_0 = arith.constant 0 : i32
    return %arg0, %arg1, %c0_i32 : i32, i32, i32
  }
  func.func @transform_5(%arg0: i32, %arg1: i32) -> (i32, i32, i32) {
    %c0_i32 = arith.constant 0 : i32
    %c0_i32_0 = arith.constant 0 : i32
    return %arg0, %arg1, %c0_i32 : i32, i32, i32
  }
}

</mosaic_0001>

<bundles_post_ra>
// kernel: tpu_custom_call.1
= control target key start
LH: loop header
LB: loop body
LE: loop exit
PB: predicated region body
PF: predicated region fallthrough
CT: control target
= control target key end

     0   :  { %s1039_s0 = inlined_call_operand.vmem [shape: f32[2], index: 0, kind: input, shape index: {}]   ;;  %s1040_s1 = inlined_call_operand.vmem [shape: f32[2,8,128], index: 1, kind: input, shape index: {}]   ;;  %s1041_s2 = inlined_call_operand.vmem [shape: f32[2,8,128], index: 2, kind: input, shape index: {}]   ;;  %s1042_s3 = inlined_call_operand.hbm [shape: f32[2,8,128], index: 3, kind: input, shape index: {}, may-alias: {3,5}]   ;;  %s1043_s4 = inlined_call_operand.hbm [shape: s8[2,8,128], index: 4, kind: output, shape index: {0}]   ;;  %s1044_s5 = inlined_call_operand.hbm [shape: f32[2,8,128], index: 5, kind: output, shape index: {1}, may-alias: {3,5}]  }
   0x1   :  { %1045 = sst [smem:[#allocation14_spill]] %s1039_s0 }
   0x2   :  { %1046 = sst [smem:[#allocation15_spill]] %s1040_s1 }
   0x3   :  { %1047 = sst [smem:[#allocation16_spill]] %s1042_s3 }
   0x4   :  { %11 = vsyncpa [#allocation5], 0 }
   0x5   :  { %12 = vsyncpa [#allocation3], 0 }
   0x6   :  { %14 = vsyncpa [#allocation3 + $0x1], 0 }
   0x7   :  { %15 = vsyncpa [#allocation4], 0 }
   0x8   :  { %17 = vsyncpa [#allocation4 + $0x1], 0 }
   0x9   :  { %18 = vsyncpa [#allocation9], 0 }
   0xa   :  { %20 = vsyncpa [#allocation9 + $0x1], 0  ;;  %s858_s18 = smov 0   ;;  %s860_s19 = smov 0  }
   0xb   :  { %s862_s20 = smov 0   ;;  %s864_s21 = smov 0  }
   0xc   :  { %s866_s22 = smov 0   ;;  %s868_s23 = smov 0  }
   0xd LB: > { %s558_s24 = sadd.s32 4294967295, %s823_s23   ;;  %s559_s25 = sadd.s32 4294967294, %s823_s23   ;;  %s823_s23 = sphi %s868_s23, %s26_s23   ;;  %s819_s22 = sphi %s866_s22, %s1062_s22   ;;  %s815_s21 = sphi %s864_s21, %s1061_s21   ;;  %s811_s20 = sphi %s862_s20, %s1060_s20   ;;  %s807_s19 = sphi %s860_s19, %s1059_s19   ;;  %s803_s18 = sphi %s858_s18, %s1058_s18  }
   0xe   : > { %p137_p0 = scmp.ne.s32.totalorder %s807_s19, %s803_s18  ;;  %p892_p1 = scmp.eq.s32.totalorder %s558_s24, 0 }
   0xf   : > { %p896_p2 = scmp.eq.s32.totalorder %s558_s24, 1  ;;  %p169_p3 = scmp.eq.s32.totalorder %s559_s25, 1 }
  0x10   : > { %p902_p4 = por %p892_p1, %p137_p0  ;;  %p560_p5 = scmp.ge.s32.totalorder %s823_s23, 1 }
  0x11   : > { %p907_p6 = por %p169_p3, %p137_p0  ;;  %p204_p7 = scmp.lt.s32.totalorder %s823_s23, 3 }
  0x12   : > { %s1052_s0 = sld [smem:[#allocation14_spill]]  ;;  %s38_s9 = sadd.s32 1, %s819_s22 }
  0x13   : > { %p915_p8 = pnand %p560_p5, %p204_p7  ;;  %s124_s10 = sadd.s32 1, %s811_s20 }
  0x14   : > { %p40_p12 = scmp.ge.s32.totalorder %s38_s9, 2  ;;  %s825_s11 = smov [#allocation2]  }
  0x15   : > { %p590_p10 = pneg %p915_p8  ;;  %p131_p13 = scmp.ne.s32.totalorder %s811_s20, %s807_s19 }
  0x16   : > { %s1064_s9 = smov (%p40_p12, %s38_s9), 0  ;;  %p132_p0 = scmp.eq.s32.totalorder %s823_s23, 0 }
  0x17   : > { %p591_p11 = pnand %p590_p10, %p892_p1  ;;  %s119_s12 = ssub.s32 %s819_s22, %s1064_s9 }
  0x18   : > { %s216_s7 = sshll.u32 %s1052_s0, 4  ;;  %p606_p3 = scmp.lt.s32.totalorder %s823_s23, 2  ;;  %s217_s7 = int_to_ptr.vmem [resolvable:$true] %s216_s7 }
  0x19   : > { %593 = dma.vmem_to_smem (!%p591_p11), %s217_s7, 16, %s825_s11, [#allocation5]  }
  0x1a   : > { %p122_p5 = scmp.eq.s32.totalorder %s119_s12, 0  ;;  %p133_p7 = por %p132_p0, %p131_p13 }
  0x1b   : > { %p936_p9 = por %p896_p2, %p131_p13  ;;  %s247_s14 = sand.u32 1, %s811_s20  }
  0x1c   : > { %s942_s15 = scalar_select %p122_p5, %s811_s20, %s124_s10  }
  0x1d   : > { %s563_s16 = sshll.u32 %s247_s14, 3  ;;  %s564_s17 = sshll.u32 %s819_s22, 3 }
  0x1e   : > { %s1055_s3 = sld [smem:[#allocation16_spill]]  ;;  %s251_s6 = scalar_lea.vmem [#allocation6], %s563_s16 }
  0x1f   : > { %s260_s7 = sshll.u32 %s251_s6, 4  ;;  %p595_p10 = pnand %p606_p3, %p133_p7  ;;  %s261_s7 = int_to_ptr.vmem [resolvable:$true] %s260_s7 }
  0x20   : > { %s248_s27 = scalar_lea.sflag [#allocation3], %s247_s14 }
  0x22   : > { %269 = sbr.rel (%p915_p8) target bundleno = 81 (0x51), region = 36 }
  0x24   : > { %s256_s30 = scalar_lea.hbm %s1055_s3, %s564_s17 }
  0x25   : > { %s258_s11 = sshll.u32 %s256_s30, 4  ;;  %s259_s11 = int_to_ptr.hbm [resolvable:$true] %s258_s11 }
  0x26   : > { %597 = dma.hbm_to_vmem [thread:$0]  (!%p595_p10), %s259_s11, 128, %s261_s7, %s248_s27  }
  0x27   : > { %786 = dma.done.wait (%p892_p1), [#allocation5], 16  }
  0x28   : > { %788 = vsyncadd (%p892_p1), [#allocation5], 4294967280  ;;  %s957_s10 = sand.u32 1, %s807_s19  }
  0x29   : > { %s567_s12 = sshll.u32 %s957_s10, 3  ;;  %s277_s16 = scalar_lea.sflag [#allocation3], %s957_s10 }
  0x2a   : > { %s280_s17 = scalar_lea.vmem [#allocation6], %s567_s12 }
  0x2b   : > { %790 = dma.done.wait (%p902_p4), %s277_s16, 128  }
  0x2c   : > { %792 = vsyncadd (%p902_p4), %s277_s16, 4294967168 }
  0x2d   : > { %286 = sfence }
  0x2e   : > { %p328_p1 = scmp.lt.s32.totalorder %s815_s21, 1  ;;  %s344_s26 = sld [smem:[#allocation2 + %s815_s21]]  ;;  %v345_v0 = vld [vmem:[%s280_s17] sm:$0xff]  ;;  %v826_v8 = vmov 0.0   ;;  %v827_v10 = vmov 0  }
  0x2f   : > { %s1056_s1 = sld [smem:[#allocation15_spill]]  ;;  %s568_s11 = sshll.u32 %s957_s10, 1 }
  0x30   : > { %s329_s8 = scalar_select %p328_p1, %s815_s21, 1 }
  0x31   : > { %s576_s27 = sshll.u32 %s815_s21, 1  ;;  %s577_s16 = sshll.u32 %s815_s21, 3 }
  0x32   : > { %s570_s14 = sshll.u32 %s329_s8, 3  ;;  %s397_s3 = scalar_lea.hbm %s1044_s5, %s577_s16 }
  0x33   : > { %s341_s28 = scalar_lea.vmem %s1041_s2, %s570_s14  ;;  %s327_s24 = scalar_lea.vmem [#allocation8], %s567_s12 }
  0x34   : > { %v348_v1 = vld [vmem:[%s341_s28] sm:$0xff]  ;;  %v346_v3 = vstv %s344_s26  ;;  %s399_s25 = sshll.u32 %s327_s24, 4  ;;  %s382_s17 = scalar_lea.hbm %s1043_s4, %s576_s27  ;;  %s400_s25 = int_to_ptr.vmem [resolvable:$true] %s399_s25 }
  0x35   : > { %s334_s30 = scalar_lea.vmem %s1056_s1, %s570_s14  ;;  %v347_v5 = vmul.f32 %v346_v3, %v345_v0  ;;  %s401_s14 = sshll.u32 %s397_s3, 4  ;;  %s402_s14 = int_to_ptr.hbm [resolvable:$true] %s401_s14 }
  0x36   : > { %v349_v2 = vld [vmem:[%s334_s30] sm:$0xff]  ;;  %s983_s26 = scalar_lea.vmem [#allocation7], %s568_s11  ;;  %s386_s0 = sshll.u32 %s382_s17, 4  ;;  %s988_s0 = int_to_ptr.hbm [resolvable:$true] %s386_s0 }
  0x37   : > { %v350_v4 = vmul.f32 %v349_v2, %v348_v1  ;;  %s384_s30 = sshll.u32 %s983_s26, 4  ;;  %s371_s1 = scalar_lea.sflag [#allocation9], %s957_s10  ;;  %s986_s30 = int_to_ptr.vmem [resolvable:$true] %s384_s30 }
  0x38   : > { %s719_s3 = sshra.s32 %s402_s14, 4  ;;  %s725_s28 = scalar_lea.hbm %s1044_s5, 16  ;;  %s720_s3 = int_to_ptr.hbm [resolvable:$true] %s719_s3 }
  0x39   : > { %v351_v6 = vadd.f32 %v350_v4, %v347_v5  ;;  %s721_s21 = scalar_lea.hbm %s720_s3, 8  ;;  %p726_p11 = scmp.lt.s32.totalorder %s720_s3, %s1044_s5 }
  0x3a   : > { %p722_p2 = scmp.ne.s32.totalorder %s720_s3, %s721_s21  ;;  %p727_p12 = scmp.lt.s32.totalorder %s725_s28, %s721_s21 }
  0x3b   : > { %v572_v7 = vadd.f32 -1.0, %v351_v6 }
  0x3c   : > { %p723_p4 = pnand %p722_p2, %p936_p9  ;;  %p728_p13 = por %p727_p12, %p726_p11 }
  0x3d   : > { %vm353_vm0 = vcmp.gt.f32.partialorder %v572_v7, 0.0 }
  0x3e   : > { %vm357_vm1 = vmpackc.low %vm353_vm0, %vm353_vm0  ;;  %v573_v9 = vsel %vm353_vm0, 1.0, %v826_v8  ;;  %p724_p8 = pneg %p723_p4 }
  0x3f   : > { %v358_v11 = vsel %vm357_vm1, 16711935, %v827_v10  ;;  %v356_v12 = vsub.f32 %v351_v6, %v573_v9 }
  0x40   : > { %v360_v13 = vpack.c.b8 %v358_v11, %v358_v11  ;;  %p729_p0 = pnand %p728_p13, %p724_p8 }
  0x41   : > { %364 = vst [vmem:[%s327_s24] sm:$0xff] %v356_v12 }
  0x42   : > { %vm361_vm2 = vnez %v360_v13 }
  0x43   : > { %732 = shalt.err (!%p729_p0)
}
  0x44   : > { %587 = dma.vmem_to_hbm [thread:$0]  (%p936_p9), %s400_s25, 128, %s402_s14, %s371_s1   ;;  %v362_v14 = vsel %vm361_vm2, 16843009, %v827_v10 }
  0x45   : > { %363 = vst [vmem:[%s983_s26] sm:$0x3] %v362_v14  ;;  %s366_s16 = scalar_lea.sflag [#allocation4], %s957_s10  ;;  %s747_s8 = sshra.s32 %s988_s0, 4  ;;  %s748_s8 = int_to_ptr.hbm [resolvable:$true] %s747_s8 }
  0x46   : > { %s749_s24 = scalar_lea.hbm %s748_s8, 2  ;;  %s753_s3 = scalar_lea.hbm %s1043_s4, 4 }
  0x47   : > { %p750_p3 = scmp.ne.s32.totalorder %s748_s8, %s749_s24  ;;  %p754_p10 = scmp.lt.s32.totalorder %s748_s8, %s1043_s4 }
  0x48   : > { %p755_p1 = scmp.lt.s32.totalorder %s753_s3, %s749_s24 }
  0x49   : > { %p751_p5 = pnand %p750_p3, %p936_p9 }
  0x4a   : > { %p756_p2 = por %p755_p1, %p754_p10 }
  0x4b   : > { %p752_p7 = pneg %p751_p5 }
  0x4d   : > { %p757_p4 = pnand %p756_p2, %p752_p7 }
  0x4f   : > { %760 = shalt.err (!%p757_p4)
}
  0x50   : > { %586 = dma.vmem_to_hbm [thread:$0]  (%p936_p9), %s986_s30, 32, %s988_s0, %s366_s16  }
  0x51 PF: > { %s413_s10 = sand.u32 1, %s803_s18   ;;  %p1057_p8 = scmp.ge.s32.totalorder %s823_s23, 2 }
  0x52   : > { %s414_s25 = scalar_lea.sflag [#allocation4], %s413_s10 }
  0x53   : > { %p599_p11 = pnand %p1057_p8, %p907_p6 }
  0x55   : > { %p600_p12 = pneg %p599_p11 }
  0x57   : > { %794 = dma.done.wait (%p600_p12), %s414_s25, 32  }
  0x58   : > { %796 = vsyncadd (%p600_p12), %s414_s25, 4294967264  ;;  %s424_s14 = scalar_lea.sflag [#allocation9], %s413_s10 }
  0x59   : > { %798 = dma.done.wait (%p600_p12), %s424_s14, 128  }
  0x5a   : > { %800 = vsyncadd (%p600_p12), %s424_s14, 4294967168  ;;  %s26_s23 = sadd.s32 1, %s823_s23   ;;  %s1058_s18 = smov %s807_s19 }
  0x5b   : > { %p23_p13 = scmp.ge.s32.totalorder %s26_s23, 4   ;;  %s1059_s19 = smov %s811_s20 }
  0x5c   : > { %s1060_s20 = smov %s942_s15  ;;  %s1061_s21 = smov %s819_s22 }
  0x5d   : > { %s1062_s22 = smov %s1064_s9  ;;  %25 = sbr.rel (!%p23_p13) target bundleno = 13 (0xd), region = 109 }
  0x62   :  { %430 = vsyncpa [#allocation3], 1 }
  0x63   :  { %432 = vsyncpa [#allocation3 + $0x1], 1 }
  0x64   :  { %433 = vsyncpa [#allocation4], 1 }
  0x65   :  { %435 = vsyncpa [#allocation4 + $0x1], 1 }
  0x66   :  { %436 = vsyncpa [#allocation9], 1 }
  0x67   :  { %438 = vsyncpa [#allocation9 + $0x1], 1 }
  0x68   :  { %439 = vsyncpa [#allocation5], 1 }
  0x69   :  { %441 = vsyncpa [#allocation5 + $0x1], 1 }

</bundles_post_ra>
